<compile_context>
chip_gen: v7x
topology: tpu7x:2x2x1
jax: 0.10.0
libtpu: 0.0.40
codegen_flags: <defaults>
</compile_context>

<pallas_src>
import functools

import jax
import jax.numpy as jnp
from jax.experimental import pallas as pl
from jax.experimental.pallas import tpu as pltpu


def _round_up(x, m):
    return ((x + m - 1) // m) * m


def _block_sizes(n, blk_i, blk_k):
    """Pick (n_pad, blk_i, blk_k) so blk_i | n_pad and blk_k | n_pad."""
    if n <= blk_i:
        return n, n, n                       # single full block, no padding
    if n <= blk_k:
        n_pad = _round_up(n, blk_i)
        return n_pad, blk_i, n_pad           # one contraction block = full dim
    blk_k = _round_up(blk_k, blk_i)          # keep blk_k a multiple of blk_i
    n_pad = _round_up(n, blk_k)
    return n_pad, blk_i, blk_k


def _buffered_block_spec(block_shape, index_map, buffers):
    """adj BlockSpec with requested pipeline depth, fallback to default."""
    if buffers is None or buffers <= 2:
        return pl.BlockSpec(block_shape, index_map)
    try:
        return pl.BlockSpec(block_shape, index_map,
                            pipeline_mode=pl.Buffered(buffers))
    except Exception:  # older jax without pipeline_mode / Buffered
        return pl.BlockSpec(block_shape, index_map)


# --------------------------------------------------------------------------
# Kernel 1: support = feat @ W  (tiny matmul, hoisted out of the adj loop)
# --------------------------------------------------------------------------
def feat_transform_kernel(feat_ref, w_ref, out_ref):
    out_ref[...] = jnp.dot(feat_ref[...], w_ref[...],
                           preferred_element_type=jnp.float32
                           ).astype(out_ref.dtype)


def _feat_transform(feat, w, blk, out_dtype):
    n_pad, f_in = feat.shape
    f_out = w.shape[1]
    out_itemsize = jnp.dtype(out_dtype).itemsize
    cost = pl.CostEstimate(
        flops=int(2 * n_pad * f_in * f_out),
        transcendentals=0,
        bytes_accessed=int(n_pad * f_in * feat.dtype.itemsize
                           + f_in * f_out * w.dtype.itemsize
                           + n_pad * f_out * out_itemsize))
    return pl.pallas_call(
        feat_transform_kernel,
        out_shape=jax.ShapeDtypeStruct((n_pad, f_out), out_dtype),
        grid_spec=pltpu.PrefetchScalarGridSpec(
            num_scalar_prefetch=0,
            grid=(n_pad // blk,),
            in_specs=[
                pl.BlockSpec((blk, f_in), lambda i: (i, 0)),    # feat row tile
                pl.BlockSpec((f_in, f_out), lambda i: (0, 0)),  # W resident
            ],
            out_specs=pl.BlockSpec((blk, f_out), lambda i: (i, 0)),
        ),
        compiler_params=pltpu.CompilerParams(
            dimension_semantics=("parallel",)),
        cost_estimate=cost,
    )(feat, w)


# --------------------------------------------------------------------------
# Kernel 2: out = act(adj @ support + b), accumulated over contraction tiles
# --------------------------------------------------------------------------
def gcn_agg_kernel(adj_ref, sup_ref, b_ref, out_ref, acc_ref, *,
                   activation, sup_block):
    k = pl.program_id(1)

    @pl.when(k == 0)
    def _init():
        acc_ref[...] = jnp.zeros_like(acc_ref)

    if sup_block is None:
        sup = sup_ref[...]                       # streamed block or full array
    else:
        start = pl.multiple_of(k * sup_block, sup_block)
        sup = sup_ref[pl.ds(start, sup_block), :]  # slice of resident support

    acc_ref[...] += jnp.dot(adj_ref[...], sup,
                            preferred_element_type=jnp.float32)

    @pl.when(k == pl.num_programs(1) - 1)
    def _finalize():
        z = acc_ref[...] + b_ref[...]            # bias added exactly once
        if activation == "relu":
            out_ref[...] = jnp.maximum(z, 0.0).astype(out_ref.dtype)
        else:  # log_softmax over the class (last) axis, in f32
            m = jnp.max(z, axis=1, keepdims=True)
            shifted = z - m
            lse = jnp.log(jnp.sum(jnp.exp(shifted), axis=1, keepdims=True))
            out_ref[...] = (shifted - lse).astype(out_ref.dtype)


def _gcn_aggregate(adj, sup, b, *, activation, blk_i, blk_k,
                   adj_buffers, sup_resident):
    n_pad = adj.shape[0]
    f_out = sup.shape[1]
    grid = (n_pad // blk_i, n_pad // blk_k)
    total_steps = grid[0] * grid[1]
    buffers = adj_buffers if total_steps >= adj_buffers else 2

    b2d = b.reshape(1, f_out).astype(jnp.float32)

    adj_spec = _buffered_block_spec((blk_i, blk_k), lambda i, k: (i, k),
                                    buffers)
    if sup_resident:
        sup_spec = pl.BlockSpec((n_pad, f_out), lambda i, k: (0, 0))
        sup_block = blk_k if blk_k != n_pad else None
    else:
        sup_spec = pl.BlockSpec((blk_k, f_out), lambda i, k: (k, 0))
        sup_block = None

    # Explicit VMEM budget from the chosen block shapes (+ headroom), clamped
    # to [32 MiB, 64 MiB]: raises the v5e 16 MiB scoped default, stays within
    # v7x's 64 MiB per-core physical VMEM.
    lane, sub = 128, 8
    f_out_p = _round_up(f_out, lane)
    vmem = max(buffers, 2) * _round_up(blk_i, sub) * _round_up(blk_k, lane) \
        * adj.dtype.itemsize
    if sup_resident:
        vmem += _round_up(n_pad, sub) * f_out_p * sup.dtype.itemsize
    else:
        vmem += 2 * _round_up(blk_k, sub) * f_out_p * sup.dtype.itemsize
    vmem += 2 * _round_up(blk_i, sub) * f_out_p * 4    # output double buffer
    vmem += _round_up(blk_i, sub) * f_out_p * 4        # f32 accumulator
    vmem += 2 * sub * lane * 4                         # bias
    vmem_limit = min(max(int(vmem * 1.25) + (4 << 20), 32 << 20), 64 << 20)

    cost = pl.CostEstimate(
        flops=int(2 * n_pad * n_pad * f_out),
        transcendentals=int(n_pad * f_out) if activation == "log_softmax" else 0,
        bytes_accessed=int(n_pad * n_pad * adj.dtype.itemsize
                           + n_pad * f_out * sup.dtype.itemsize
                           + n_pad * f_out * 4 + f_out * 4))

    return pl.pallas_call(
        functools.partial(gcn_agg_kernel, activation=activation,
                          sup_block=sup_block),
        out_shape=jax.ShapeDtypeStruct((n_pad, f_out), jnp.float32),
        grid_spec=pltpu.PrefetchScalarGridSpec(
            num_scalar_prefetch=0,
            grid=grid,
            in_specs=[
                adj_spec,                                      # adj row/k tile
                sup_spec,                                      # support
                pl.BlockSpec((1, f_out), lambda i, k: (0, 0)),  # bias resident
            ],
            out_specs=pl.BlockSpec((blk_i, f_out), lambda i, k: (i, 0)),
            scratch_shapes=[pltpu.VMEM((blk_i, f_out), jnp.float32)],
        ),
        compiler_params=pltpu.CompilerParams(
            dimension_semantics=("parallel", "arbitrary"),
            vmem_limit_bytes=vmem_limit),
        cost_estimate=cost,
    )(adj, sup, b2d)


# --------------------------------------------------------------------------
# Full forward
# --------------------------------------------------------------------------
def gcn_drop_in_forward(x, adj, w1, b1, w2, b2, *,
                        blk_i=512, blk_k=2048, adj_buffers=3,
                        sup_resident_max_bytes=8 << 20):
    """GCN_drop_in inference forward.  adj is used in its stored dtype."""
    n = adj.shape[0]
    n_pad, blk_i, blk_k = _block_sizes(n, blk_i, blk_k)

    # Pad once; reuse the padded adj for BOTH layers, keep h padded between
    # them (zero adj padding guarantees padded rows never leak into real rows).
    if n_pad != n:
        adj = jnp.pad(adj, ((0, n_pad - n), (0, n_pad - n)))
        x = jnp.pad(x, ((0, n_pad - n), (0, 0)))

    # Match the support dtype to adj's MXU dtype when adj is stored narrow.
    sup_dtype = adj.dtype if adj.dtype.itemsize < 4 else jnp.float32

    def layer(feat, w, b, activation):
        f_out = w.shape[1]
        sup = _feat_transform(feat, w, blk_i, sup_dtype)
        resident_bytes = n_pad * _round_up(f_out, 128) * sup.dtype.itemsize
        sup_resident = resident_bytes <= sup_resident_max_bytes
        return _gcn_aggregate(adj, sup, b, activation=activation,
                              blk_i=blk_i, blk_k=blk_k,
                              adj_buffers=adj_buffers,
                              sup_resident=sup_resident)

    h = layer(x, w1, b1, "relu")                # (n_pad, nhid), f32
    out = layer(h, w2, b2, "log_softmax")       # (n_pad, nclass), f32
    return out[:n] if n_pad != n else out


def reference_forward(x, adj, w1, b1, w2, b2):
    adj = adj.astype(jnp.float32)
    h = jnp.maximum(adj @ (x @ w1) + b1, 0.0)
    z = adj @ (h @ w2) + b2
    return jax.nn.log_softmax(z, axis=1)


def _make_inputs(key, n, nfeat, nhid, nclass):
    k_x, k_adj, k_w1, k_b1, k_w2, k_b2 = jax.random.split(key, 6)

    x = jax.random.normal(k_x, (n, nfeat), dtype=jnp.float32)

    # Symmetric row-normalized-ish dense adjacency, deterministic.
    a = jax.random.uniform(k_adj, (n, n), dtype=jnp.float32)
    a = (a + a.T) * 0.5 + jnp.eye(n, dtype=jnp.float32)
    adj = a / jnp.sum(a, axis=1, keepdims=True)

    s1 = 1.0 / jnp.sqrt(jnp.float32(nfeat))
    s2 = 1.0 / jnp.sqrt(jnp.float32(nhid))
    w1 = jax.random.uniform(k_w1, (nfeat, nhid), jnp.float32, -s1, s1)
    b1 = jax.random.uniform(k_b1, (nhid,), jnp.float32, -s1, s1)
    w2 = jax.random.uniform(k_w2, (nhid, nclass), jnp.float32, -s2, s2)
    b2 = jax.random.uniform(k_b2, (nclass,), jnp.float32, -s2, s2)
    return x, adj, w1, b1, w2, b2


if __name__ == "__main__":
    nfeat, nhid, nclass = 16, 32, 8
    key = jax.random.PRNGKey(0)
    k_small, k_big = jax.random.split(key, 2)

    # --- Case 1: small module-scale shapes (single-block path) ---
    N = 32
    x, adj, w1, b1, w2, b2 = _make_inputs(k_small, N, nfeat, nhid, nclass)
    out = jax.block_until_ready(gcn_drop_in_forward(x, adj, w1, b1, w2, b2))
    ref = reference_forward(x, adj, w1, b1, w2, b2)
    assert out.shape == (N, nclass)
    assert jnp.allclose(out, ref, atol=1e-4, rtol=1e-4)

    # --- Case 2: tiled / padded accumulation path, rectangular adj tiles,
    #     VMEM-resident support (N=200 -> padded 256, grid (4, 2)) ---
    N2 = 200
    x2, adj2, w1b, b1b, w2b, b2b = _make_inputs(k_big, N2, nfeat, nhid, nclass)
    out2 = jax.block_until_ready(
        gcn_drop_in_forward(x2, adj2, w1b, b1b, w2b, b2b, blk_i=64, blk_k=128))
    ref2 = reference_forward(x2, adj2, w1b, b1b, w2b, b2b)
    assert out2.shape == (N2, nclass)
    assert jnp.allclose(out2, ref2, atol=1e-4, rtol=1e-4)

    # --- Case 3: adj stored persistently in bf16 (cast once, OUTSIDE the
    #     forward) + streamed (non-resident) support path; f32 accumulation ---
    adj2_bf16 = adj2.astype(jnp.bfloat16)   # persistent storage format
    out3 = jax.block_until_ready(
        gcn_drop_in_forward(x2, adj2_bf16, w1b, b1b, w2b, b2b,
                            blk_i=64, blk_k=128, sup_resident_max_bytes=0))
    assert out3.shape == (N2, nclass)
    assert jnp.allclose(out3, ref2, atol=5e-2, rtol=5e-2)

    print("KERNEL_OK")
</pallas_src>

<mosaic_0001>
module attributes {stable_mosaic.version = 11 : i64} {
  func.func @feat_transform_kernel(%arg0: i32, %arg1: memref<32x16xf32, #tpu.memory_space<vmem>>, %arg2: memref<16x32xf32, #tpu.memory_space<vmem>>, %arg3: memref<32x32xf32, #tpu.memory_space<vmem>>) attributes {dimension_semantics = [#tpu.dimension_semantics<parallel>], iteration_bounds = array<i64: 1>, scalar_prefetch = 0 : i64, scratch_operands = 0 : i64, tpu.core_type = #tpu.core_type<tc>, window_params = [{transform_indices = @transform_0, window_bounds = array<i64: 32, 16>}, {pipeline_mode = #tpu.pipeline_mode<synchronous>, transform_indices = @transform_1, window_bounds = array<i64: 16, 32>}, {transform_indices = @transform_2, window_bounds = array<i64: 32, 32>}]} {
    %c0 = arith.constant 0 : index
    %c0_0 = arith.constant 0 : index
    %0 = vector.load %arg1[%c0, %c0_0] : memref<32x16xf32, #tpu.memory_space<vmem>>, vector<32x16xf32>
    %c0_1 = arith.constant 0 : index
    %c0_2 = arith.constant 0 : index
    %1 = vector.load %arg2[%c0_1, %c0_2] : memref<16x32xf32, #tpu.memory_space<vmem>>, vector<16x32xf32>
    %cst = arith.constant dense<0.000000e+00> : vector<32x32xf32>
    %2 = tpu.matmul %0, %1, %cst {dimension_numbers = #tpu.dot_dimension_numbers<[1], [0], [0], [1], [0, 0, 1, 1], [], []>} : vector<32x16xf32>, vector<16x32xf32>, vector<32x32xf32> -> vector<32x32xf32>
    %c0_3 = arith.constant 0 : index
    %c0_4 = arith.constant 0 : index
    %3 = vector.load %arg3[%c0_3, %c0_4] : memref<32x32xf32, #tpu.memory_space<vmem>>, vector<32x32xf32>
    tpu.vector_store %arg3[%c0_3, %c0_4], %2 {strides = array<i32>} : memref<32x32xf32, #tpu.memory_space<vmem>>, vector<32x32xf32>,
    return
  }
  func.func @transform_0(%arg0: i32) -> (i32, i32) {
    %c0_i32 = arith.constant 0 : i32
    %c0_i32_0 = arith.constant 0 : i32
    return %arg0, %c0_i32 : i32, i32
  }
  func.func @transform_1(%arg0: i32) -> (i32, i32) {
    %c0_i32 = arith.constant 0 : i32
    %c0_i32_0 = arith.constant 0 : i32
    %c0_i32_1 = arith.constant 0 : i32
    return %c0_i32, %c0_i32_0 : i32, i32
  }
  func.func @transform_2(%arg0: i32) -> (i32, i32) {
    %c0_i32 = arith.constant 0 : i32
    %c0_i32_0 = arith.constant 0 : i32
    return %arg0, %c0_i32 : i32, i32
  }
}

</mosaic_0001>

<bundles_post_ra>
// kernel: tpu_custom_call.1
= control target key start
LH: loop header
LB: loop body
LE: loop exit
PB: predicated region body
PF: predicated region fallthrough
CT: control target
= control target key end

     0   :  { %vm18_vm0 = vcmask 130048   ;;  %s238_s0 = inlined_call_operand.vmem [shape: f32[32,16], index: 0, kind: input, shape index: {}]   ;;  %s239_s1 = inlined_call_operand.vmem [shape: f32[16,32], index: 1, kind: input, shape index: {}]   ;;  %s240_s2 = inlined_call_operand.hbm [shape: f32[32,32], index: 2, kind: output, shape index: {}]  }
   0x1   :  { %v16_v0 = vld [vmem:[%s239_s1] sm:$0xff]  ;;  %v17_v1 = vld [vmem:[%s239_s1 + $0x8] sm:$0xff]  ;;  %v14_v4 = vld [vmem:[%s238_s0 + $0x10] sm:$0xff] }
   0x2   :  { %v12_v2 = vld [vmem:[%s238_s0] sm:$0xff]  ;;  %v157_v3 = vpack.c.bf16 %v17_v1, %v16_v0  ;;  %154 = vmatprep.mubr.msk.f32.mxu1 %vm18_vm0, %v14_v4 }
   0x3   :  { %151 = vmatprep.mubr.msk.f32.mxu0 %vm18_vm0, %v12_v2 }
   0x4   :  { %7 = vsyncpa [#allocation3], 0  ;;  %158 = vmatprep.subr.bf16.mxu0 %v157_v3  ;;  %161 = vmatprep.subr.bf16.mxu1 %v157_v3  ;;  %v13_v5 = vld [vmem:[%s238_s0 + $0x8] sm:$0xff]  ;;  %v15_v6 = vld [vmem:[%s238_s0 + $0x18] sm:$0xff]  ;;  %s190_s20 = smov [#allocation2]   ;;  %vm116_vm1 = vcmask 261120  }
   0x5   :  { %160 = vmatpush3.bf16.msra.mxu0 %v157_v3  ;;  %162 = vmatpush3.bf16.msra.mxu1 %v157_v3  ;;  %s126_s21 = sshll.u32 %s190_s20, 4  ;;  %s127_s21 = int_to_ptr.vmem [resolvable:$true] %s126_s21 }
   0x6   :  { %s166_s22 = scalar_lea.vmem %s127_s21, 512  ;;  %p171_p1 = scmp.lt.s32.totalorder %s127_s21, %s127_s21 }
   0x7   :  { %p167_p0 = scmp.ne.s32.totalorder %s127_s21, %s166_s22  ;;  %p172_p2 = scmp.lt.s32.totalorder %s166_s22, %s166_s22 }
   0x8   :  { %152 = vmatmul.mubr.msk.f32.vlgmr.msra.gmra.mrb[0].mxu0 %vm18_vm0, %v13_v5  ;;  %155 = vmatmul.mubr.msk.f32.vlgmr.msra.gmra.mrb[0].mxu1 %vm18_vm0, %v15_v6 }
   0x9   :  { %p173_p3 = por %p172_p2, %p171_p1 }
   0xb   :  { %p174_p4 = pnand %p173_p3, %p167_p0 }
  0xdb   :  { %v153_v7 = vpop.f32.mrb[0].mxu0  ;;  %v156_v8 = vpop.f32.mrb[0].mxu1 }
  0xdc   :  { %118 = vst.msk [vmem:[#allocation2 + $0x8] sm:$0xff] %vm116_vm1, %v153_v7  ;;  %120 = vst.msk [vmem:[#allocation2 + $0x18] sm:$0xff] %vm116_vm1, %v156_v8  ;;  %v97_v9 = vpop.f32.mrb[1].mxu0  ;;  %v107_v10 = vpop.f32.mrb[1].mxu1 }
  0xdd   :  { %117 = vst.msk [vmem:[#allocation2] sm:$0xff] %vm116_vm1, %v97_v9  ;;  %119 = vst.msk [vmem:[#allocation2 + $0x10] sm:$0xff] %vm116_vm1, %v107_v10 }
  0xde   :  { %177 = shalt.err (!%p174_p4)
}
  0xdf   :  { %s178_s24 = scalar_lea.hbm %s240_s2, 512 }
  0xe0   :  { %p179_p5 = scmp.ne.s32.totalorder %s240_s2, %s178_s24  ;;  %p182_p6 = scmp.lt.u32.totalorder %s178_s24, %s240_s2 }
  0xe2   :  { %p184_p7 = pnand %p182_p6, %p179_p5 }
  0xe4   :  { %187 = shalt.err (!%p184_p7)
}
  0xe5   :  { %s191_s29 = smov 128   ;;  %s192_s30 = smov 8  }
  0xe6   :  { %132 = dma.vmem_to_hbm [thread:$0]  %s127_s21, 512, %s240_s2, [#allocation3], %s191_s29, %s191_s29, %s192_s30  }
  0xe7   :  { %188 = dma.done.wait [#allocation3], 512  }
  0xe8   :  { %189 = vsyncadd [#allocation3], 4294966784 }
  0xe9   :  { %136 = vsyncpa [#allocation3], 1 }

</bundles_post_ra>
